<compile_context>
chip_gen: v5e
topology: v5e:2x2
jax: 0.10.0
libtpu: 0.0.40
codegen_flags: <defaults>
</compile_context>

<pallas_src>
import jax
import jax.numpy as jnp
from jax.experimental import pallas as pl
from jax.experimental.pallas import tpu as pltpu

# ----- problem sizes (small, consistent with the module's forward) -----
B = 2        # batch
T = 8        # sequence length
D = 16       # encoder_config['input_size']  (feature dim per step)
H = 64       # encoder hidden width
L = 32       # decoder_config['latent_dim']
C = 32       # conductor embedding width
HD = 64      # per-step decoder hidden width
O = 16       # decoder_config['output_size']


def _softplus(x):
    # numerically-stable softplus using only exp/log (VPU/EUP friendly)
    return jnp.maximum(x, 0.0) + jnp.log1p(jnp.exp(-jnp.abs(x)))


def vae_kernel(x_flat_ref, eps_ref,
               w1_ref, b1_ref, wms_ref, bms_ref,
               wc_ref, bc_ref, wdcb_ref, wdxb_ref, bd_ref, wob_ref, bo_ref,
               mu_ref, sigma_ref, z_ref, out_ref):
    """Fused VAE forward.

    Everything fits in VMEM at these sizes, so the kernel runs as a single
    grid point with full-array blocks.  All time steps are batched along the
    lane dimension (T*C, T*HD, T*O), so there are exactly 6 MXU matmuls, one
    tanh / sigmoid / softplus each on full vregs, and a single unmasked
    (B, T*O) = (2, 128) output store.
    """
    x_flat = x_flat_ref[...]             # (B, T*D)  = (2, 128)
    eps = eps_ref[...]                   # (B, L)    = (2, 32)

    # ---------------- Encoder ----------------
    h = jnp.maximum(
        jnp.dot(x_flat, w1_ref[...], preferred_element_type=jnp.float32)
        + b1_ref[...], 0.0)                                            # (B, H)
    # fused mu / sigma projection: one (H, 2L) matmul, then lane-slice
    ms = jnp.dot(h, wms_ref[...],
                 preferred_element_type=jnp.float32) + bms_ref[...]    # (B, 2L)
    mu = ms[:, :L]                                                     # (B, L)
    sigma = _softplus(ms[:, L:])                                       # (B, L)
    z = mu + sigma * eps                                               # (B, L)

    mu_ref[...] = mu
    sigma_ref[...] = sigma
    z_ref[...] = z

    # ------------- Hierarchical decoder (all T steps batched) -------------
    # conductor: one (B, L) @ (L, T*C) matmul, lane-packed over time steps
    cond = jnp.tanh(
        jnp.dot(z, wc_ref[...], preferred_element_type=jnp.float32)
        + bc_ref[...])                                                 # (B, T*C)
    # per-step hidden: block-diagonal weights keep the time packing in lanes
    hd = jnp.maximum(
        jnp.dot(cond, wdcb_ref[...], preferred_element_type=jnp.float32)
        + jnp.dot(x_flat, wdxb_ref[...], preferred_element_type=jnp.float32)
        + bd_ref[...], 0.0)                                            # (B, T*HD)
    # output projection + single lane-dense (2, 128) store
    out_ref[...] = jax.nn.sigmoid(
        jnp.dot(hd, wob_ref[...], preferred_element_type=jnp.float32)
        + bo_ref[...])                                                 # (B, T*O)


def init_params(key):
    ks = jax.random.split(key, 14)
    s = 0.1
    f32 = jnp.float32
    return dict(
        w1=jax.random.normal(ks[0], (T * D, H), f32) * s,
        b1=jax.random.normal(ks[1], (1, H), f32) * 0.01,
        wmu=jax.random.normal(ks[2], (H, L), f32) * s,
        bmu=jax.random.normal(ks[3], (1, L), f32) * 0.01,
        wsig=jax.random.normal(ks[4], (H, L), f32) * s,
        bsig=jax.random.normal(ks[5], (1, L), f32) * 0.01,
        wc=jax.random.normal(ks[6], (T, L, C), f32) * s,
        bc=jax.random.normal(ks[7], (T, C), f32) * 0.01,
        wdc=jax.random.normal(ks[8], (C, HD), f32) * s,
        wdx=jax.random.normal(ks[9], (D, HD), f32) * s,
        bd=jax.random.normal(ks[10], (1, HD), f32) * 0.01,
        wo=jax.random.normal(ks[11], (HD, O), f32) * s,
        bo=jax.random.normal(ks[12], (1, O), f32) * 0.01,
    )


def _block_diag(w, reps):
    """(K, N) -> (reps*K, reps*N) block-diagonal; bd[t*K+k, t*N+n] = w[k, n]."""
    k, n = w.shape
    eye = jnp.eye(reps, dtype=w.dtype)
    return jnp.einsum('st,kn->sktn', eye, w).reshape(reps * k, reps * n)


def pack_params(p):
    """One-time wrapper-side packing so the kernel sees lane-dense operands."""
    return dict(
        w1=p['w1'],                                                   # (T*D, H)
        b1=p['b1'],                                                   # (1, H)
        wms=jnp.concatenate([p['wmu'], p['wsig']], axis=1),           # (H, 2L)
        bms=jnp.concatenate([p['bmu'], p['bsig']], axis=1),           # (1, 2L)
        # wc_packed[l, t*C+c] = wc[t, l, c]
        wc=jnp.transpose(p['wc'], (1, 0, 2)).reshape(L, T * C),       # (L, T*C)
        bc=p['bc'].reshape(1, T * C),                                 # (1, T*C)
        wdcb=_block_diag(p['wdc'], T),                                # (T*C, T*HD)
        wdxb=_block_diag(p['wdx'], T),                                # (T*D, T*HD)
        bd=jnp.tile(p['bd'], (1, T)),                                 # (1, T*HD)
        wob=_block_diag(p['wo'], T),                                  # (T*HD, T*O)
        bo=jnp.tile(p['bo'], (1, T)),                                 # (1, T*O)
    )


def vae_forward(x, eps, pp):
    x_flat = x.reshape(B, T * D)   # glue reshape kept in plain JAX
    inputs = (x_flat, eps,
              pp['w1'], pp['b1'], pp['wms'], pp['bms'],
              pp['wc'], pp['bc'], pp['wdcb'], pp['wdxb'], pp['bd'],
              pp['wob'], pp['bo'])
    out_shape = (
        jax.ShapeDtypeStruct((B, L), jnp.float32),        # mu
        jax.ShapeDtypeStruct((B, L), jnp.float32),        # sigma
        jax.ShapeDtypeStruct((B, L), jnp.float32),        # z
        jax.ShapeDtypeStruct((B, T * O), jnp.float32),    # decoder out (lane-dense)
    )
    vmem = pl.BlockSpec(memory_space=pltpu.MemorySpace.VMEM)
    mu, sigma, z, out_flat = pl.pallas_call(
        vae_kernel,
        out_shape=out_shape,
        in_specs=[vmem] * len(inputs),
        out_specs=tuple([vmem] * len(out_shape)),
    )(*inputs)
    # out_flat[b, t*O + o] == out[b, t, o]  -> row-major reshape is exact
    return mu, sigma, z, out_flat.reshape(B, T, O)


def vae_reference(x, eps, p):
    """Pure-JAX reference (same math, unpacked params) for a correctness check."""
    x_flat = x.reshape(B, T * D)
    h = jnp.maximum(x_flat @ p['w1'] + p['b1'], 0.0)
    mu = h @ p['wmu'] + p['bmu']
    sigma = jax.nn.softplus(h @ p['wsig'] + p['bsig'])
    z = mu + sigma * eps
    cond = jnp.tanh(jnp.einsum('bl,tlc->btc', z, p['wc']) + p['bc'][None])
    hd = jnp.maximum(jnp.einsum('btc,ch->bth', cond, p['wdc'])
                     + jnp.einsum('btd,dh->bth', x, p['wdx'])
                     + p['bd'][None], 0.0)
    out = jax.nn.sigmoid(jnp.einsum('bth,ho->bto', hd, p['wo']) + p['bo'][None])
    return mu, sigma, z, out


if __name__ == "__main__":
    key = jax.random.PRNGKey(0)
    k_x, k_eps, k_p = jax.random.split(key, 3)

    x = jax.random.normal(k_x, (B, T, D), jnp.float32)      # input_sequence
    eps = jax.random.normal(k_eps, (B, L), jnp.float32)     # reparam noise
    params = init_params(k_p)
    packed = pack_params(params)                            # one-time packing

    mu, sigma, z, out = vae_forward(x, eps, packed)
    jax.block_until_ready((mu, sigma, z, out))

    # sanity: shapes + numerical agreement with pure-JAX reference
    assert mu.shape == (B, L) and sigma.shape == (B, L)
    assert z.shape == (B, L) and out.shape == (B, T, O)
    mu_r, sigma_r, z_r, out_r = vae_reference(x, eps, params)
    for a, b in ((mu, mu_r), (sigma, sigma_r), (z, z_r), (out, out_r)):
        assert jnp.allclose(a, b, atol=1e-2, rtol=1e-2), "mismatch vs reference"

    print("KERNEL_OK")
</pallas_src>

<mosaic_0001>
module attributes {stable_mosaic.version = 11 : i64} {
  func.func @vae_kernel(%arg0: memref<2x128xf32, #tpu.memory_space<vmem>>, %arg1: memref<2x32xf32, #tpu.memory_space<vmem>>, %arg2: memref<128x64xf32, #tpu.memory_space<vmem>>, %arg3: memref<1x64xf32, #tpu.memory_space<vmem>>, %arg4: memref<64x64xf32, #tpu.memory_space<vmem>>, %arg5: memref<1x64xf32, #tpu.memory_space<vmem>>, %arg6: memref<32x256xf32, #tpu.memory_space<vmem>>, %arg7: memref<1x256xf32, #tpu.memory_space<vmem>>, %arg8: memref<256x512xf32, #tpu.memory_space<vmem>>, %arg9: memref<128x512xf32, #tpu.memory_space<vmem>>, %arg10: memref<1x512xf32, #tpu.memory_space<vmem>>, %arg11: memref<512x128xf32, #tpu.memory_space<vmem>>, %arg12: memref<1x128xf32, #tpu.memory_space<vmem>>, %arg13: memref<2x32xf32, #tpu.memory_space<vmem>>, %arg14: memref<2x32xf32, #tpu.memory_space<vmem>>, %arg15: memref<2x32xf32, #tpu.memory_space<vmem>>, %arg16: memref<2x128xf32, #tpu.memory_space<vmem>>) attributes {dimension_semantics = [], scalar_prefetch = 0 : i64, scratch_operands = 0 : i64, tpu.core_type = #tpu.core_type<tc>} {
    %c0 = arith.constant 0 : index
    %c0_0 = arith.constant 0 : index
    %0 = vector.load %arg0[%c0, %c0_0] : memref<2x128xf32, #tpu.memory_space<vmem>>, vector<2x128xf32>
    %c0_1 = arith.constant 0 : index
    %c0_2 = arith.constant 0 : index
    %1 = vector.load %arg1[%c0_1, %c0_2] : memref<2x32xf32, #tpu.memory_space<vmem>>, vector<2x32xf32>
    %c0_3 = arith.constant 0 : index
    %c0_4 = arith.constant 0 : index
    %2 = vector.load %arg2[%c0_3, %c0_4] : memref<128x64xf32, #tpu.memory_space<vmem>>, vector<128x64xf32>
    %cst = arith.constant dense<0.000000e+00> : vector<2x64xf32>
    %3 = tpu.matmul %0, %2, %cst {dimension_numbers = #tpu.dot_dimension_numbers<[1], [0], [0], [1], [0, 0, 1, 1], [], []>} : vector<2x128xf32>, vector<128x64xf32>, vector<2x64xf32> -> vector<2x64xf32>
    %c0_5 = arith.constant 0 : index
    %c0_6 = arith.constant 0 : index
    %4 = vector.load %arg3[%c0_5, %c0_6] : memref<1x64xf32, #tpu.memory_space<vmem>>, vector<1x64xf32>
    %5 = vector.broadcast %4 : vector<1x64xf32> to vector<2x64xf32>
    %6 = arith.addf %3, %5 : vector<2x64xf32>
    %cst_7 = arith.constant 0.000000e+00 : f32
    %7 = vector.broadcast %cst_7 : f32 to vector<2x64xf32>
    %8 = arith.maximumf %6, %7 : vector<2x64xf32>
    %c0_8 = arith.constant 0 : index
    %c0_9 = arith.constant 0 : index
    %9 = vector.load %arg4[%c0_8, %c0_9] : memref<64x64xf32, #tpu.memory_space<vmem>>, vector<64x64xf32>
    %cst_10 = arith.constant dense<0.000000e+00> : vector<2x64xf32>
    %10 = tpu.matmul %8, %9, %cst_10 {dimension_numbers = #tpu.dot_dimension_numbers<[1], [0], [0], [1], [0, 0, 1, 1], [], []>} : vector<2x64xf32>, vector<64x64xf32>, vector<2x64xf32> -> vector<2x64xf32>
    %c0_11 = arith.constant 0 : index
    %c0_12 = arith.constant 0 : index
    %11 = vector.load %arg5[%c0_11, %c0_12] : memref<1x64xf32, #tpu.memory_space<vmem>>, vector<1x64xf32>
    %12 = vector.broadcast %11 : vector<1x64xf32> to vector<2x64xf32>
    %13 = arith.addf %10, %12 : vector<2x64xf32>
    %14 = vector.extract_strided_slice %13 {offsets = [0, 0], sizes = [2, 32], strides = [1, 1]} : vector<2x64xf32> to vector<2x32xf32>
    %15 = vector.extract_strided_slice %13 {offsets = [0, 32], sizes = [2, 32], strides = [1, 1]} : vector<2x64xf32> to vector<2x32xf32>
    %cst_13 = arith.constant 0.000000e+00 : f32
    %16 = vector.broadcast %cst_13 : f32 to vector<2x32xf32>
    %17 = arith.maximumf %15, %16 : vector<2x32xf32>
    %18 = math.absf %15 : vector<2x32xf32>
    %cst_14 = arith.constant 0.000000e+00 : f32
    %19 = vector.broadcast %cst_14 : f32 to vector<2x32xf32>
    %20 = arith.subf %19, %18 : vector<2x32xf32>
    %21 = math.exp %20 : vector<2x32xf32>
    %22 = math.log1p %21 : vector<2x32xf32>
    %23 = arith.addf %17, %22 : vector<2x32xf32>
    %24 = arith.mulf %23, %1 : vector<2x32xf32>
    %25 = arith.addf %14, %24 : vector<2x32xf32>
    %c0_15 = arith.constant 0 : index
    %c0_16 = arith.constant 0 : index
    %26 = vector.load %arg13[%c0_15, %c0_16] : memref<2x32xf32, #tpu.memory_space<vmem>>, vector<2x32xf32>
    tpu.vector_store %arg13[%c0_15, %c0_16], %14 {strides = array<i32>} : memref<2x32xf32, #tpu.memory_space<vmem>>, vector<2x32xf32>,
    %c0_17 = arith.constant 0 : index
    %c0_18 = arith.constant 0 : index
    %27 = vector.load %arg14[%c0_17, %c0_18] : memref<2x32xf32, #tpu.memory_space<vmem>>, vector<2x32xf32>
    tpu.vector_store %arg14[%c0_17, %c0_18], %23 {strides = array<i32>} : memref<2x32xf32, #tpu.memory_space<vmem>>, vector<2x32xf32>,
    %c0_19 = arith.constant 0 : index
    %c0_20 = arith.constant 0 : index
    %28 = vector.load %arg15[%c0_19, %c0_20] : memref<2x32xf32, #tpu.memory_space<vmem>>, vector<2x32xf32>
    tpu.vector_store %arg15[%c0_19, %c0_20], %25 {strides = array<i32>} : memref<2x32xf32, #tpu.memory_space<vmem>>, vector<2x32xf32>,
    %c0_21 = arith.constant 0 : index
    %c0_22 = arith.constant 0 : index
    %29 = vector.load %arg6[%c0_21, %c0_22] : memref<32x256xf32, #tpu.memory_space<vmem>>, vector<32x256xf32>
    %cst_23 = arith.constant dense<0.000000e+00> : vector<2x256xf32>
    %30 = tpu.matmul %25, %29, %cst_23 {dimension_numbers = #tpu.dot_dimension_numbers<[1], [0], [0], [1], [0, 0, 1, 1], [], []>} : vector<2x32xf32>, vector<32x256xf32>, vector<2x256xf32> -> vector<2x256xf32>
    %c0_24 = arith.constant 0 : index
    %c0_25 = arith.constant 0 : index
    %31 = vector.load %arg7[%c0_24, %c0_25] : memref<1x256xf32, #tpu.memory_space<vmem>>, vector<1x256xf32>
    %32 = vector.broadcast %31 : vector<1x256xf32> to vector<2x256xf32>
    %33 = arith.addf %30, %32 : vector<2x256xf32>
    %34 = math.tanh %33 : vector<2x256xf32>
    %c0_26 = arith.constant 0 : index
    %c0_27 = arith.constant 0 : index
    %35 = vector.load %arg8[%c0_26, %c0_27] : memref<256x512xf32, #tpu.memory_space<vmem>>, vector<256x512xf32>
    %cst_28 = arith.constant dense<0.000000e+00> : vector<2x512xf32>
    %36 = tpu.matmul %34, %35, %cst_28 {dimension_numbers = #tpu.dot_dimension_numbers<[1], [0], [0], [1], [0, 0, 1, 1], [], []>} : vector<2x256xf32>, vector<256x512xf32>, vector<2x512xf32> -> vector<2x512xf32>
    %c0_29 = arith.constant 0 : index
    %c0_30 = arith.constant 0 : index
    %37 = vector.load %arg9[%c0_29, %c0_30] : memref<128x512xf32, #tpu.memory_space<vmem>>, vector<128x512xf32>
    %cst_31 = arith.constant dense<0.000000e+00> : vector<2x512xf32>
    %38 = tpu.matmul %0, %37, %cst_31 {dimension_numbers = #tpu.dot_dimension_numbers<[1], [0], [0], [1], [0, 0, 1, 1], [], []>} : vector<2x128xf32>, vector<128x512xf32>, vector<2x512xf32> -> vector<2x512xf32>
    %39 = arith.addf %36, %38 : vector<2x512xf32>
    %c0_32 = arith.constant 0 : index
    %c0_33 = arith.constant 0 : index
    %40 = vector.load %arg10[%c0_32, %c0_33] : memref<1x512xf32, #tpu.memory_space<vmem>>, vector<1x512xf32>
    %41 = vector.broadcast %40 : vector<1x512xf32> to vector<2x512xf32>
    %42 = arith.addf %39, %41 : vector<2x512xf32>
    %cst_34 = arith.constant 0.000000e+00 : f32
    %43 = vector.broadcast %cst_34 : f32 to vector<2x512xf32>
    %44 = arith.maximumf %42, %43 : vector<2x512xf32>
    %c0_35 = arith.constant 0 : index
    %c0_36 = arith.constant 0 : index
    %45 = vector.load %arg11[%c0_35, %c0_36] : memref<512x128xf32, #tpu.memory_space<vmem>>, vector<512x128xf32>
    %cst_37 = arith.constant dense<0.000000e+00> : vector<2x128xf32>
    %46 = tpu.matmul %44, %45, %cst_37 {dimension_numbers = #tpu.dot_dimension_numbers<[1], [0], [0], [1], [0, 0, 1, 1], [], []>} : vector<2x512xf32>, vector<512x128xf32>, vector<2x128xf32> -> vector<2x128xf32>
    %c0_38 = arith.constant 0 : index
    %c0_39 = arith.constant 0 : index
    %47 = vector.load %arg12[%c0_38, %c0_39] : memref<1x128xf32, #tpu.memory_space<vmem>>, vector<1x128xf32>
    %48 = vector.broadcast %47 : vector<1x128xf32> to vector<2x128xf32>
    %49 = arith.addf %46, %48 : vector<2x128xf32>
    %50 = arith.negf %49 : vector<2x128xf32>
    %51 = math.exp %50 : vector<2x128xf32>
    %cst_40 = arith.constant 1.000000e+00 : f32
    %52 = vector.broadcast %cst_40 : f32 to vector<2x128xf32>
    %53 = arith.addf %52, %51 : vector<2x128xf32>
    %54 = arith.divf %52, %53 : vector<2x128xf32>
    %c0_41 = arith.constant 0 : index
    %c0_42 = arith.constant 0 : index
    %55 = vector.load %arg16[%c0_41, %c0_42] : memref<2x128xf32, #tpu.memory_space<vmem>>, vector<2x128xf32>
    tpu.vector_store %arg16[%c0_41, %c0_42], %54 {strides = array<i32>} : memref<2x128xf32, #tpu.memory_space<vmem>>, vector<2x128xf32>,
    return
  }
}

</mosaic_0001>

<bundles_post_ra>
// kernel: tpu_custom_call.1
= control target key start
LH: loop header
LB: loop body
LE: loop exit
PB: predicated region body
PF: predicated region fallthrough
CT: control target
= control target key end

     0   :  { %s1416_s0 = inlined_call_operand.vmem [shape: f32[2,128], index: 0, kind: input, shape index: {}]   ;;  %s1417_s1 = inlined_call_operand.vmem [shape: f32[2,32], index: 1, kind: input, shape index: {}]   ;;  %s1418_s2 = inlined_call_operand.vmem [shape: f32[128,64], index: 2, kind: input, shape index: {}]   ;;  %s1419_s3 = inlined_call_operand.vmem [shape: f32[1,64], index: 3, kind: input, shape index: {}]   ;;  %s1420_s4 = inlined_call_operand.vmem [shape: f32[64,64], index: 4, kind: input, shape index: {}]   ;;  %s1421_s5 = inlined_call_operand.vmem [shape: f32[1,64], index: 5, kind: input, shape index: {}]   ;;  %s1422_s6 = inlined_call_operand.vmem [shape: f32[32,256], index: 6, kind: input, shape index: {}]   ;;  %s1423_s7 = inlined_call_operand.vmem [shape: f32[1,256], index: 7, kind: input, shape index: {}]   ;;  %s1424_s8 = inlined_call_operand.hbm [shape: f32[256,512], index: 8, kind: input, shape index: {}]   ;;  %s1425_s9 = inlined_call_operand.hbm [shape: f32[128,512], index: 9, kind: input, shape index: {}]   ;;  %s1426_s10 = inlined_call_operand.vmem [shape: f32[1,512], index: 10, kind: input, shape index: {}]   ;;  %s1427_s11 = inlined_call_operand.hbm [shape: f32[512,128], index: 11, kind: input, shape index: {}]   ;;  %s1428_s12 = inlined_call_operand.vmem [shape: f32[1,128], index: 12, kind: input, shape index: {}]   ;;  %s1429_s13 = inlined_call_operand.hbm [shape: f32[2,32], index: 13, kind: output, shape index: {0}]   ;;  %s1430_s14 = inlined_call_operand.hbm [shape: f32[2,32], index: 14, kind: output, shape index: {1}]   ;;  %s1431_s15 = inlined_call_operand.hbm [shape: f32[2,32], index: 15, kind: output, shape index: {2}]   ;;  %s1432_s16 = inlined_call_operand.hbm [shape: f32[2,128], index: 16, kind: output, shape index: {3}]  }
   0x1   :  { %1433 = sst [smem:[#allocation19_spill]] %s1416_s0 }
   0x2   :  { %22 = vsyncpa [#allocation3], 0 }
   0x3   :  { %23 = vsyncpa [#allocation6], 0 }
   0x4   :  { %24 = vsyncpa [#allocation4], 0 }
   0x5   :  { %25 = vsyncpa [#allocation10], 0 }
   0x6   :  { %26 = vsyncpa [#allocation13], 0  ;;  %s60_s23 = sshll.u32 %s1425_s9, 4  ;;  %s1162_s24 = smov [#allocation5]   ;;  %s61_s23 = int_to_ptr.hbm [resolvable:$true] %s60_s23 }
   0x7   :  { %s62_s25 = sshll.u32 %s1162_s24, 4  ;;  %s47_s28 = sshll.u32 %s1424_s8, 4  ;;  %s63_s25 = int_to_ptr.vmem [resolvable:$true] %s62_s25  ;;  %s48_s28 = int_to_ptr.hbm [resolvable:$true] %s47_s28 }
   0x8   :  { %s1163_s29 = smov 512   ;;  %s1164_s30 = smov 32  }
   0x9   :  { %68 = dma.hbm_to_vmem [thread:$0]  %s61_s23, 8192, %s63_s25, [#allocation6], %s1163_s29, %s1163_s29, %s1164_s30  }
   0xa   :  { %s1165_s0 = smov [#allocation2]   ;;  %s75_s20 = sshll.u32 %s1427_s11, 4  ;;  %s76_s20 = int_to_ptr.hbm [resolvable:$true] %s75_s20 }
   0xb   :  { %s49_s17 = sshll.u32 %s1165_s0, 4  ;;  %s1166_s9 = smov [#allocation7]   ;;  %s50_s17 = int_to_ptr.vmem [resolvable:$true] %s49_s17 }
   0xc   :  { %55 = dma.hbm_to_vmem [thread:$0]  %s48_s28, 16384, %s50_s17, [#allocation3], %s1163_s29, %s1163_s29, %s1164_s30  }
   0xd   :  { %s77_s21 = sshll.u32 %s1166_s9, 4  ;;  %s1167_s22 = smov 128   ;;  %s78_s21 = int_to_ptr.vmem [resolvable:$true] %s77_s21 }
   0xe   :  { %s1168_s8 = smov 8  }
   0xf   :  { %83 = dma.hbm_to_vmem [thread:$0]  %s76_s20, 8192, %s78_s21, [#allocation6], %s1167_s22, %s1167_s22, %s1168_s8  }
  0x10   :  { %1152 = dma.done.wait [#allocation3], 16384  }
  0x11   :  { %1153 = vsyncadd [#allocation3], 4294950912 }
  0x12   :  { %1154 = dma.done.wait [#allocation6], 16384  }
  0x13   :  { %1155 = vsyncadd [#allocation6], 4294950912  ;;  %v115_v0 = vld [vmem:[%s1418_s2 + $0x78] sm:$0xff]  ;;  %v114_v1 = vld [vmem:[%s1418_s2 + $0x70] sm:$0xff]  ;;  %s1434_s18 = sld [smem:[#allocation19_spill]]  ;;  %vm153_vm0 = vcmask 523264  }
  0x14   :  { %120 = vmatpush.msra.mxu0 %v115_v0  ;;  %v113_v2 = vld [vmem:[%s1418_s2 + $0x68] sm:$0xff]  ;;  %v112_v3 = vld [vmem:[%s1418_s2 + $0x60] sm:$0xff]  ;;  %v148_v4 = vld [vmem:[%s1420_s4 + $0x38] sm:$0xff]  ;;  %vm202_vm1 = vcmask 254976   ;;  %s1169_s0 = smov 96   ;;  %vm224_vm3 = vcmask 261120  }
  0x15   :  { %v111_v5 = vld [vmem:[%s1418_s2 + $0x58] sm:$0xff]  ;;  %165 = vmatpush.msra.mxu1 %v148_v4  ;;  %v147_v6 = vld [vmem:[%s1420_s4 + $0x30] sm:$0xff]  ;;  %v146_v7 = vld [vmem:[%s1420_s4 + $0x28] sm:$0xff]  ;;  %s906_s25 = sshll.u32 %s1430_s14, 4  ;;  %s1170_s11 = smov [#allocation9]   ;;  %s907_s25 = int_to_ptr.hbm [resolvable:$true] %s906_s25 }
  0x16   :  { %121 = vmatpush.msra.mxu0 %v114_v1  ;;  %v110_v8 = vld [vmem:[%s1418_s2 + $0x50] sm:$0xff]  ;;  %v145_v9 = vld [vmem:[%s1420_s4 + $0x20] sm:$0xff]  ;;  %v109_v10 = vld [vmem:[%s1418_s2 + $0x48] sm:$0xff]  ;;  %s904_s26 = sshll.u32 %s1170_s11, 4  ;;  %s895_s28 = sshll.u32 %s1429_s13, 4  ;;  %s905_s26 = int_to_ptr.vmem [resolvable:$true] %s904_s26  ;;  %s896_s28 = int_to_ptr.hbm [resolvable:$true] %s895_s28 }
  0x17   :  { %166 = vmatpush.msra.mxu1 %v147_v6  ;;  %v144_v11 = vld [vmem:[%s1420_s4 + $0x18] sm:$0xff]  ;;  %v108_v12 = vld [vmem:[%s1418_s2 + $0x40] sm:$0xff]  ;;  %v106_v14 = vld [vmem:[%s1418_s2 + $0x30] sm:$0xff]  ;;  %s928_s20 = sshll.u32 %s1432_s16, 4  ;;  %s929_s20 = int_to_ptr.hbm [resolvable:$true] %s928_s20 }
  0x18   :  { %122 = vmatpush.msra.mxu0 %v113_v2  ;;  %v107_v13 = vld [vmem:[%s1418_s2 + $0x38] sm:$0xff]  ;;  %v105_v15 = vld [vmem:[%s1418_s2 + $0x28] sm:$0xff]  ;;  %v104_v16 = vld [vmem:[%s1418_s2 + $0x20] sm:$0xff] }
  0x19   :  { %167 = vmatpush.msra.mxu1 %v146_v7  ;;  %v103_v17 = vld [vmem:[%s1418_s2 + $0x18] sm:$0xff]  ;;  %v102_v18 = vld [vmem:[%s1418_s2 + $0x10] sm:$0xff]  ;;  %v101_v19 = vld [vmem:[%s1418_s2 + $0x8] sm:$0xff] }
  0x1a   :  { %123 = vmatpush.msra.mxu0 %v112_v3  ;;  %v100_v20 = vld [vmem:[%s1418_s2] sm:$0xff]  ;;  %v143_v22 = vld [vmem:[%s1420_s4 + $0x10] sm:$0xff]  ;;  %v142_v23 = vld [vmem:[%s1420_s4 + $0x8] sm:$0xff] }
  0x1b   :  { %168 = vmatpush.msra.mxu1 %v145_v9  ;;  %v1336_v21 = vld [vmem:[%s1434_s18] sm:$0x3]  ;;  %v216_v32 = vld [vmem:[%s1422_s6 + $0x30] sm:$0xff]  ;;  %v217_v33 = vld [vmem:[%s1422_s6 + $0x38] sm:$0xff] }
  0x1c   :  { %124 = vmatpush.msra.mxu0 %v111_v5  ;;  %v141_v24 = vld [vmem:[%s1420_s4] sm:$0xff]  ;;  %240 = vmatpush.msra.mxu2 %v216_v32  ;;  %v215_v36 = vld [vmem:[%s1422_s6 + $0x28] sm:$0xff]  ;;  %v212_v53 = vld [vmem:[%s1422_s6 + $0x10] sm:$0xff]  ;;  %s1171_s4 = smov [#allocation8]  }
  0x1d   :  { %169 = vmatpush.msra.mxu1 %v144_v11  ;;  %v99_v25 = vld [vmem:[%s1417_s1] sm:$0x3]  ;;  %260 = vmatpush.msra.mxu3 %v217_v33  ;;  %v213_v54 = vld [vmem:[%s1422_s6 + $0x18] sm:$0xff]  ;;  %v211_v56 = vld [vmem:[%s1422_s6 + $0x8] sm:$0xff]  ;;  %s893_s27 = sshll.u32 %s1171_s4, 4  ;;  %s894_s27 = int_to_ptr.vmem [resolvable:$true] %s893_s27 }
  0x1e   :  { %125 = vmatpush.msra.mxu0 %v110_v8  ;;  %193 = vrot.lane.b32.xlu0 %v99_v25, %s1164_s30  ;;  %v969_v26 = vld [vmem:[%s1419_s3] ss:$0 sm:$0xff]  ;;  %v459_v58 = vld [vmem:[#allocation5 + $0x1e8] sm:$0xff]  ;;  %v460_v59 = vld [vmem:[#allocation5 + $0x1f0] sm:$0xff] }
  0x1f   :  { %170 = vmatpush.msra.mxu1 %v143_v22  ;;  %v970_v30 = vld [vmem:[%s1421_s5] ss:$0 sm:$0xff]  ;;  %261 = vmatpush.msra.mxu3 %v215_v36  ;;  %v461_v60 = vld [vmem:[#allocation5 + $0x1f8] sm:$0xff]  ;;  %v455_v62 = vld [vmem:[#allocation5 + $0x1c8] sm:$0xff]  ;;  %s917_s5 = sshll.u32 %s1431_s15, 4  ;;  %s918_s5 = int_to_ptr.hbm [resolvable:$true] %s917_s5 }
  0x20   :  { %126 = vmatpush.msra.mxu0 %v109_v10  ;;  %v214_v34 = vld [vmem:[%s1422_s6 + $0x20] sm:$0xff]  ;;  %v456_v63 = vld [vmem:[#allocation5 + $0x1d0] sm:$0xff]  ;;  %v457_v0 = vld [vmem:[#allocation5 + $0x1d8] sm:$0xff] }
  0x21   :  { %171 = vmatpush.msra.mxu1 %v142_v23  ;;  %241 = vmatpush.msra.mxu2 %v214_v34  ;;  %v210_v55 = vld [vmem:[%s1422_s6] sm:$0xff]  ;;  %v451_v2 = vld [vmem:[#allocation5 + $0x1a8] sm:$0xff]  ;;  %v452_v3 = vld [vmem:[#allocation5 + $0x1b0] sm:$0xff] }
  0x22   :  { %127 = vmatpush.msra.mxu0 %v108_v12  ;;  %262 = vmatpush.msra.mxu3 %v213_v54  ;;  %v458_v57 = vld [vmem:[#allocation5 + $0x1e0] sm:$0xff]  ;;  %v453_v4 = vld [vmem:[#allocation5 + $0x1b8] sm:$0xff]  ;;  %v447_v6 = vld [vmem:[#allocation5 + $0x188] sm:$0xff] }
  0x23   :  { %172 = vmatpush.msra.mxu1 %v141_v24  ;;  %242 = vmatpush.msra.mxu2 %v212_v53  ;;  %v454_v61 = vld [vmem:[#allocation5 + $0x1c0] sm:$0xff]  ;;  %v448_v7 = vld [vmem:[#allocation5 + $0x190] sm:$0xff]  ;;  %v449_v8 = vld [vmem:[#allocation5 + $0x198] sm:$0xff] }
  0x24   :  { %128 = vmatpush.msra.mxu0 %v107_v13  ;;  %263 = vmatpush.msra.mxu3 %v211_v56  ;;  %v450_v1 = vld [vmem:[#allocation5 + $0x1a0] sm:$0xff]  ;;  %v443_v10 = vld [vmem:[#allocation5 + $0x168] sm:$0xff]  ;;  %v444_v11 = vld [vmem:[#allocation5 + $0x170] sm:$0xff] }
  0x25   :  { %243 = vmatpush.msra.mxu2 %v210_v55  ;;  %502 = vmatpush.msrb.mxu1 %v460_v59  ;;  %v446_v5 = vld [vmem:[#allocation5 + $0x180] sm:$0xff]  ;;  %v445_v12 = vld [vmem:[#allocation5 + $0x178] sm:$0xff]  ;;  %v431_v23 = vld [vmem:[#allocation5 + $0x108] sm:$0xff] }
  0x26   :  { %129 = vmatpush.msra.mxu0 %v106_v14  ;;  %482 = vmatpush.msrb.mxu3 %v459_v58  ;;  %v442_v9 = vld [vmem:[#allocation5 + $0x160] sm:$0xff]  ;;  %v439_v14 = vld [vmem:[#allocation5 + $0x148] sm:$0xff]  ;;  %v432_v24 = vld [vmem:[#allocation5 + $0x110] sm:$0xff] }
  0x27   :  { %462 = vmatpush.msrb.mxu2 %v458_v57  ;;  %503 = vmatpush.msrb.mxu1 %v456_v63  ;;  %v438_v13 = vld [vmem:[#allocation5 + $0x140] sm:$0xff]  ;;  %v433_v25 = vld [vmem:[#allocation5 + $0x118] sm:$0xff]  ;;  %v424_v32 = vld [vmem:[#allocation5 + $0xd0] sm:$0xff] }
  0x28   :  { %130 = vmatpush.msra.mxu0 %v105_v15  ;;  %483 = vmatpush.msrb.mxu3 %v455_v62  ;;  %v440_v15 = vld [vmem:[#allocation5 + $0x150] sm:$0xff]  ;;  %v430_v22 = vld [vmem:[#allocation5 + $0x100] sm:$0xff]  ;;  %v425_v33 = vld [vmem:[#allocation5 + $0xd8] sm:$0xff] }
  0x29   :  { %463 = vmatpush.msrb.mxu2 %v454_v61  ;;  %504 = vmatpush.msrb.mxu1 %v452_v3  ;;  %v418_v34 = vld [vmem:[#allocation5 + $0xa0] sm:$0xff]  ;;  %v419_v36 = vld [vmem:[#allocation5 + $0xa8] sm:$0xff]  ;;  %v404_v54 = vld [vmem:[#allocation5 + $0x30] sm:$0xff] }
  0x2a   :  { %131 = vmatpush.msra.mxu0 %v104_v16  ;;  %484 = vmatpush.msrb.mxu3 %v451_v2  ;;  %v441_v16 = vld [vmem:[#allocation5 + $0x158] sm:$0xff]  ;;  %v398_v56 = vld [vmem:[#allocation5] sm:$0xff]  ;;  %v399_v57 = vld [vmem:[#allocation5 + $0x8] sm:$0xff] }
  0x2b   :  { %464 = vmatpush.msrb.mxu2 %v450_v1  ;;  %505 = vmatpush.msrb.mxu1 %v448_v7  ;;  %v405_v55 = vld [vmem:[#allocation5 + $0x38] sm:$0xff]  ;;  %v330_v62 = vld [vmem:[#allocation2 + $0x1e0] sm:$0xff]  ;;  %v395_v1 = vld [vmem:[#allocation2 + $0x3e8] sm:$0xff] }
  0x2c   :  { %132 = vmatpush.msra.mxu0 %v103_v17  ;;  %485 = vmatpush.msrb.mxu3 %v447_v6  ;;  %v434_v17 = vld [vmem:[#allocation5 + $0x120] sm:$0xff]  ;;  %v401_v61 = vld [vmem:[#allocation5 + $0x18] sm:$0xff]  ;;  %v323_v7 = vld [vmem:[#allocation2 + $0x1a8] sm:$0xff] }
  0x2d   :  { %465 = vmatpush.msrb.mxu2 %v446_v5  ;;  %506 = vmatpush.msrb.mxu1 %v444_v11  ;;  %v394_v63 = vld [vmem:[#allocation2 + $0x3e0] sm:$0xff]  ;;  %v319_v11 = vld [vmem:[#allocation2 + $0x188] sm:$0xff] }
  0x2e   :  { %133 = vmatpush.msra.mxu0 %v102_v18  ;;  %486 = vmatpush.msrb.mxu3 %v443_v10  ;;  %v435_v18 = vld [vmem:[#allocation5 + $0x128] sm:$0xff]  ;;  %v326_v2 = vld [vmem:[#allocation2 + $0x1c0] sm:$0xff] }
  0x2f   :  { %466 = vmatpush.msrb.mxu2 %v442_v9  ;;  %507 = vmatpush.msrb.mxu1 %v440_v15  ;;  %v390_v3 = vld [vmem:[#allocation2 + $0x3c0] sm:$0xff]  ;;  %v315_v15 = vld [vmem:[#allocation2 + $0x168] sm:$0xff] }
  0x30   :  { %134 = vmatpush.msra.mxu0 %v101_v19  ;;  %487 = vmatpush.msrb.mxu3 %v439_v14  ;;  %v436_v19 = vld [vmem:[#allocation5 + $0x130] sm:$0xff]  ;;  %v322_v5 = vld [vmem:[#allocation2 + $0x1a0] sm:$0xff] }
  0x31   :  { %467 = vmatpush.msrb.mxu2 %v438_v13  ;;  %508 = vmatpush.msrb.mxu1 %v436_v19  ;;  %v386_v6 = vld [vmem:[#allocation2 + $0x3a0] sm:$0xff]  ;;  %v311_v19 = vld [vmem:[#allocation2 + $0x148] sm:$0xff] }
  0x32   :  { %135 = vmatpush.msra.mxu0 %v100_v20  ;;  %v437_v20 = vld [vmem:[#allocation5 + $0x138] sm:$0xff]  ;;  %488 = vmatpush.msrb.mxu3 %v435_v18  ;;  %v318_v9 = vld [vmem:[#allocation2 + $0x180] sm:$0xff] }
  0x33   :  { %136 = vmatmul.f32.vlgmr.msra.gmra.mxu0 %v1336_v21  ;;  %468 = vmatpush.msrb.mxu2 %v434_v17  ;;  %v382_v10 = vld [vmem:[#allocation2 + $0x380] sm:$0xff] }
  0x34   :  { %522 = vmatpush.msrb.mxu0 %v461_v60  ;;  %489 = vmatpush.msrb.mxu3 %v431_v23  ;;  %v400_v60 = vld [vmem:[#allocation5 + $0x10] sm:$0xff]  ;;  %v314_v13 = vld [vmem:[#allocation2 + $0x160] sm:$0xff] }
  0x35   :  { %469 = vmatpush.msrb.mxu2 %v430_v22  ;;  %509 = vmatpush.msrb.mxu1 %v432_v24  ;;  %v378_v14 = vld [vmem:[#allocation2 + $0x360] sm:$0xff]  ;;  %v307_v24 = vld [vmem:[#allocation2 + $0x128] sm:$0xff] }
  0x36   :  { %523 = vmatpush.msrb.mxu0 %v457_v0  ;;  %v331_v0 = vld [vmem:[#allocation2 + $0x1e8] sm:$0xff]  ;;  %v310_v17 = vld [vmem:[#allocation2 + $0x140] sm:$0xff] }
  0x37   :  { %v374_v18 = vld [vmem:[#allocation2 + $0x340] sm:$0xff] }
  0x38   :  { %524 = vmatpush.msrb.mxu0 %v453_v4  ;;  %v391_v4 = vld [vmem:[#allocation2 + $0x3c8] sm:$0xff]  ;;  %v306_v22 = vld [vmem:[#allocation2 + $0x120] sm:$0xff] }
  0x39   :  { %v370_v23 = vld [vmem:[#allocation2 + $0x320] sm:$0xff] }
  0x3a   :  { %525 = vmatpush.msrb.mxu0 %v449_v8  ;;  %v387_v8 = vld [vmem:[#allocation2 + $0x3a8] sm:$0xff] }
  0x3c   :  { %526 = vmatpush.msrb.mxu0 %v445_v12  ;;  %v383_v12 = vld [vmem:[#allocation2 + $0x388] sm:$0xff] }
  0x3e   :  { %527 = vmatpush.msrb.mxu0 %v441_v16  ;;  %v379_v16 = vld [vmem:[#allocation2 + $0x368] sm:$0xff] }
  0x40   :  { %528 = vmatpush.msrb.mxu0 %v437_v20  ;;  %v375_v20 = vld [vmem:[#allocation2 + $0x348] sm:$0xff] }
  0x42   :  { %529 = vmatpush.msrb.mxu0 %v433_v25  ;;  %v371_v25 = vld [vmem:[#allocation2 + $0x328] sm:$0xff] }
  0x90   :  { %v194_v49 = vpop.permute.xlu0 %193 }
  0xb0   :  { %v137_v27 = vpop.f32.mrf.mxu0 }
  0xb1   :  { %v138_v28 = vadd.f32 %v969_v26, %v137_v27  ;;  %v426_v26 = vld [vmem:[#allocation5 + $0xe0] sm:$0xff]  ;;  %v427_v27 = vld [vmem:[#allocation5 + $0xe8] sm:$0xff] }
  0xb2   :  { %470 = vmatpush.msrb.mxu2 %v426_v26  ;;  %490 = vmatpush.msrb.mxu3 %v427_v27  ;;  %v302_v26 = vld [vmem:[#allocation2 + $0x100] sm:$0xff] }
  0xb3   :  { %v140_v29 = vmax.f32 %v138_v28, 0.0  ;;  %v428_v28 = vld [vmem:[#allocation5 + $0xf0] sm:$0xff]  ;;  %v366_v27 = vld [vmem:[#allocation2 + $0x300] sm:$0xff] }
  0xb4   :  { %510 = vmatpush.msrb.mxu1 %v428_v28  ;;  %v303_v28 = vld [vmem:[#allocation2 + $0x108] sm:$0xff] }
  0xb5   :  { %953 = vmatmul.msk.f32.vlgmr.msra.gmra.mxu1 %vm153_vm0, %v140_v29  ;;  %v429_v29 = vld [vmem:[#allocation5 + $0xf8] sm:$0xff] }
  0xb6   :  { %530 = vmatpush.msrb.mxu0 %v429_v29  ;;  %511 = vmatpush.msrb.mxu1 %v424_v32  ;;  %v367_v29 = vld [vmem:[#allocation2 + $0x308] sm:$0xff] }
  0xb7   :  { %v299_v32 = vld [vmem:[#allocation2 + $0xe8] sm:$0xff] }
  0xb8   :  { %531 = vmatpush.msrb.mxu0 %v425_v33  ;;  %v363_v33 = vld [vmem:[#allocation2 + $0x2e8] sm:$0xff] }
 0x132   :  { %v174_v31 = vpop.f32.mrf.mxu1 }
 0x133   :  { %v1367_v35 = vadd.f32 %v970_v30, %v174_v31  ;;  %v422_v30 = vld [vmem:[#allocation5 + $0xc0] sm:$0xff]  ;;  %v423_v31 = vld [vmem:[#allocation5 + $0xc8] sm:$0xff] }
 0x134   :  { %471 = vmatpush.msrb.mxu2 %v422_v30  ;;  %491 = vmatpush.msrb.mxu3 %v423_v31  ;;  %v298_v30 = vld [vmem:[#allocation2 + $0xe0] sm:$0xff] }
 0x135   :  { %v178_v37 = vand.u32 2147483647, %v1367_v35  ;;  %203 = vst.msk [vmem:[#allocation8] sm:$0x3] %vm202_vm1, %v1367_v35  ;;  %v177_v48 = vmax.f32 %v1367_v35, 0.0  ;;  %v362_v31 = vld [vmem:[#allocation2 + $0x2e0] sm:$0xff] }
 0x136   :  { %472 = vmatpush.msrb.mxu2 %v418_v34  ;;  %492 = vmatpush.msrb.mxu3 %v419_v36  ;;  %v294_v34 = vld [vmem:[#allocation2 + $0xc0] sm:$0xff]  ;;  %898 = dma.vmem_to_hbm [thread:$0]  %s894_s27, 32, %s896_s28, [#allocation4]  }
 0x137   :  { %v179_v38 = vsub.f32 0.0, %v178_v37  ;;  %v420_v37 = vld [vmem:[#allocation5 + $0xb0] sm:$0xff]  ;;  %v358_v36 = vld [vmem:[#allocation2 + $0x2c0] sm:$0xff] }
 0x138   :  { %512 = vmatpush.msrb.mxu1 %v420_v37  ;;  %v295_v37 = vld [vmem:[#allocation2 + $0xc8] sm:$0xff] }
 0x139   :  { %v180_v39 = vmul.f32 1.442695, %v179_v38  ;;  %v421_v38 = vld [vmem:[#allocation5 + $0xb8] sm:$0xff] }
 0x13a   :  { %532 = vmatpush.msrb.mxu0 %v421_v38  ;;  %v359_v38 = vld [vmem:[#allocation2 + $0x2c8] sm:$0xff] }
 0x13b   :  { %972 = vpow2.f32 %v180_v39  ;;  %v414_v39 = vld [vmem:[#allocation5 + $0x80] sm:$0xff] }
 0x13c   :  { %473 = vmatpush.msrb.mxu2 %v414_v39  ;;  %v290_v39 = vld [vmem:[#allocation2 + $0xa0] sm:$0xff] }
 0x141   :  { %v973_v40 = vpop.eup %972 }
 0x142   :  { %v182_v41 = vadd.f32 1.0, %v973_v40  ;;  %v185_v42 = vmul.f32 -0.5, %v973_v40  ;;  %v188_v44 = vand.u32 2147483647, %v973_v40 }
 0x144   :  { %974 = vlog2.f32 %v182_v41  ;;  %v186_v43 = vadd.f32 1.0, %v185_v42  ;;  %vm189_vm2 = vcmp.lt.f32.partialorder %v188_v44, 0.0004427343  ;;  %v416_v41 = vld [vmem:[#allocation5 + $0x90] sm:$0xff]  ;;  %v417_v42 = vld [vmem:[#allocation5 + $0x98] sm:$0xff]  ;;  %v411_v44 = vld [vmem:[#allocation5 + $0x68] sm:$0xff] }
 0x145   :  { %513 = vmatpush.msrb.mxu1 %v416_v41  ;;  %533 = vmatpush.msrb.mxu0 %v417_v42  ;;  %v291_v41 = vld [vmem:[#allocation2 + $0xa8] sm:$0xff] }
 0x146   :  { %v187_v47 = vmul.f32 %v973_v40, %v186_v43  ;;  %v415_v40 = vld [vmem:[#allocation5 + $0x88] sm:$0xff]  ;;  %v410_v43 = vld [vmem:[#allocation5 + $0x60] sm:$0xff] }
 0x147   :  { %493 = vmatpush.msrb.mxu3 %v415_v40  ;;  %474 = vmatpush.msrb.mxu2 %v410_v43  ;;  %v354_v40 = vld [vmem:[#allocation2 + $0x2a0] sm:$0xff]  ;;  %v355_v42 = vld [vmem:[#allocation2 + $0x2a8] sm:$0xff] }
 0x148   :  { %v286_v43 = vld [vmem:[#allocation2 + $0x80] sm:$0xff] }
 0x149   :  { %494 = vmatpush.msrb.mxu3 %v411_v44  ;;  %v350_v44 = vld [vmem:[#allocation2 + $0x280] sm:$0xff] }
 0x14a   :  { %v975_v45 = vpop.eup %974 }
 0x14b   :  { %v184_v46 = vmul.f32 0.6931472, %v975_v45  ;;  %v412_v45 = vld [vmem:[#allocation5 + $0x70] sm:$0xff] }
 0x14c   :  { %514 = vmatpush.msrb.mxu1 %v412_v45  ;;  %v287_v45 = vld [vmem:[#allocation2 + $0x88] sm:$0xff] }
 0x14d   :  { %v190_v50 = vsel %vm189_vm2, %v187_v47, %v184_v46  ;;  %v413_v46 = vld [vmem:[#allocation5 + $0x78] sm:$0xff]  ;;  %v406_v47 = vld [vmem:[#allocation5 + $0x40] sm:$0xff] }
 0x14e   :  { %v191_v51 = vadd.f32 %v190_v50, %v177_v48  ;;  %v407_v48 = vld [vmem:[#allocation5 + $0x48] sm:$0xff]  ;;  %v409_v50 = vld [vmem:[#allocation5 + $0x58] sm:$0xff]  ;;  %534 = vmatpush.msrb.mxu0 %v413_v46  ;;  %475 = vmatpush.msrb.mxu2 %v406_v47  ;;  %v282_v47 = vld [vmem:[#allocation2 + $0x60] sm:$0xff] }
 0x14f   :  { %495 = vmatpush.msrb.mxu3 %v407_v48  ;;  %v351_v46 = vld [vmem:[#allocation2 + $0x288] sm:$0xff]  ;;  %v346_v48 = vld [vmem:[#allocation2 + $0x260] sm:$0xff] }
 0x150   :  { %v196_v52 = vmul.f32 %v194_v49, %v191_v51  ;;  %205 = vrot.lane.b32.xlu1 %v191_v51, %s1169_s0  ;;  %v408_v49 = vld [vmem:[#allocation5 + $0x50] sm:$0xff]  ;;  %v402_v51 = vld [vmem:[#allocation5 + $0x20] sm:$0xff]  ;;  %535 = vmatpush.msrb.mxu0 %v409_v50  ;;  %v347_v50 = vld [vmem:[#allocation2 + $0x268] sm:$0xff] }
 0x151   :  { %515 = vmatpush.msrb.mxu1 %v408_v49  ;;  %476 = vmatpush.msrb.mxu2 %v402_v51  ;;  %v283_v49 = vld [vmem:[#allocation2 + $0x68] sm:$0xff]  ;;  %v278_v51 = vld [vmem:[#allocation2 + $0x40] sm:$0xff] }
 0x152   :  { %198 = vrot.lane.b32.xlu0 %v196_v52, %s1169_s0  ;;  %v403_v52 = vld [vmem:[#allocation5 + $0x28] sm:$0xff]  ;;  %536 = vmatpush.msrb.mxu0 %v405_v55  ;;  %v274_v55 = vld [vmem:[#allocation2 + $0x20] sm:$0xff]  ;;  %s1172_s0 = smov [#allocation11]  }
 0x153   :  { %496 = vmatpush.msrb.mxu3 %v403_v52  ;;  %516 = vmatpush.msrb.mxu1 %v404_v54  ;;  %v342_v52 = vld [vmem:[#allocation2 + $0x240] sm:$0xff]  ;;  %v343_v54 = vld [vmem:[#allocation2 + $0x248] sm:$0xff]  ;;  %s915_s14 = sshll.u32 %s1172_s0, 4  ;;  %s916_s14 = int_to_ptr.vmem [resolvable:$true] %s915_s14 }
 0x154   :  { %477 = vmatpush.msrb.mxu2 %v398_v56  ;;  %537 = vmatpush.msrb.mxu0 %v401_v61  ;;  %v338_v56 = vld [vmem:[#allocation2 + $0x220] sm:$0xff]  ;;  %v271_v61 = vld [vmem:[#allocation2 + $0x8] sm:$0xff] }
 0x155   :  { %497 = vmatpush.msrb.mxu3 %v399_v57  ;;  %517 = vmatpush.msrb.mxu1 %v400_v60  ;;  %v275_v57 = vld [vmem:[#allocation2 + $0x28] sm:$0xff]  ;;  %v334_v60 = vld [vmem:[#allocation2 + $0x200] sm:$0xff] }
 0x156   :  { %602 = vmatpush.msra.mxu0 %v395_v1  ;;  %v333_v1 = vld [vmem:[#allocation2 + $0x1f8] sm:$0xff]  ;;  %518 = vmatmul.f32.vlgmr.msrb.gmra.mxu1 %v1336_v21 }
 0x157   :  { %582 = vmatpush.msra.mxu1 %v331_v0  ;;  %v396_v0 = vld [vmem:[#allocation2 + $0x3f0] sm:$0xff]  ;;  %538 = vmatmul.f32.vlgmr.msrb.gmra.mxu0 %v1336_v21 }
 0x158   :  { %603 = vmatpush.msra.mxu0 %v391_v4  ;;  %v329_v4 = vld [vmem:[#allocation2 + $0x1d8] sm:$0xff] }
 0x15a   :  { %604 = vmatpush.msra.mxu0 %v387_v8  ;;  %v325_v8 = vld [vmem:[#allocation2 + $0x1b8] sm:$0xff] }
 0x15c   :  { %605 = vmatpush.msra.mxu0 %v383_v12  ;;  %v385_v12 = vld [vmem:[#allocation2 + $0x398] sm:$0xff] }
 0x15e   :  { %606 = vmatpush.msra.mxu0 %v379_v16  ;;  %v381_v16 = vld [vmem:[#allocation2 + $0x378] sm:$0xff] }
 0x160   :  { %607 = vmatpush.msra.mxu0 %v375_v20  ;;  %v377_v20 = vld [vmem:[#allocation2 + $0x358] sm:$0xff] }
 0x162   :  { %608 = vmatpush.msra.mxu0 %v371_v25  ;;  %v373_v25 = vld [vmem:[#allocation2 + $0x338] sm:$0xff] }
 0x164   :  { %609 = vmatpush.msra.mxu0 %v367_v29  ;;  %v369_v29 = vld [vmem:[#allocation2 + $0x318] sm:$0xff] }
 0x166   :  { %610 = vmatpush.msra.mxu0 %v363_v33  ;;  %v365_v33 = vld [vmem:[#allocation2 + $0x2f8] sm:$0xff] }
 0x168   :  { %611 = vmatpush.msra.mxu0 %v359_v38  ;;  %v361_v38 = vld [vmem:[#allocation2 + $0x2d8] sm:$0xff] }
 0x16a   :  { %612 = vmatpush.msra.mxu0 %v355_v42  ;;  %v357_v42 = vld [vmem:[#allocation2 + $0x2b8] sm:$0xff] }
 0x16c   :  { %613 = vmatpush.msra.mxu0 %v351_v46  ;;  %v353_v46 = vld [vmem:[#allocation2 + $0x298] sm:$0xff] }
 0x16e   :  { %614 = vmatpush.msra.mxu0 %v347_v50  ;;  %v349_v50 = vld [vmem:[#allocation2 + $0x278] sm:$0xff] }
 0x170   :  { %615 = vmatpush.msra.mxu0 %v343_v54  ;;  %v345_v54 = vld [vmem:[#allocation2 + $0x258] sm:$0xff] }
 0x1c2   :  { %v206_v53 = vpop.permute.xlu1 %205 }
 0x1c3   :  { %208 = vst.msk [vmem:[#allocation9] sm:$0x3] %vm202_vm1, %v206_v53  ;;  %v279_v53 = vld [vmem:[#allocation2 + $0x48] sm:$0xff] }
 0x1c4   :  { %v199_v58 = vpop.permute.xlu0 %198  ;;  %909 = dma.vmem_to_hbm [thread:$0]  %s905_s26, 32, %s907_s25, [#allocation10]  }
 0x1c5   :  { %v201_v59 = vadd.f32 %v199_v58, %v1367_v35  ;;  %v327_v35 = vld [vmem:[#allocation2 + $0x1c8] sm:$0xff] }
 0x1c6   :  { %583 = vmatpush.msra.mxu1 %v327_v35  ;;  %v339_v58 = vld [vmem:[#allocation2 + $0x228] sm:$0xff]  ;;  %v392_v35 = vld [vmem:[#allocation2 + $0x3d0] sm:$0xff] }
 0x1c7   :  { %209 = vst.msk [vmem:[#allocation11] sm:$0x3] %vm202_vm1, %v201_v59  ;;  %954 = vmatmul.msk.f32.vlgmr.msra.gmra.mxu2 %vm224_vm3, %v201_v59  ;;  %955 = vmatmul.msk.f32.vlgmr.msra.gmra.mxu3 %vm224_vm3, %v201_v59  ;;  %v270_v59 = vld [vmem:[#allocation2] sm:$0xff] }
 0x1c8   :  { %542 = vmatpush.msra.mxu2 %v330_v62  ;;  %562 = vmatpush.msra.mxu3 %v394_v63  ;;  %v335_v62 = vld [vmem:[#allocation2 + $0x208] sm:$0xff]  ;;  %v332_v63 = vld [vmem:[#allocation2 + $0x1f0] sm:$0xff]  ;;  %920 = dma.vmem_to_hbm [thread:$0]  %s916_s14, 32, %s918_s5, [#allocation10]  }
 0x1c9   :  { %584 = vmatpush.msra.mxu1 %v323_v7  ;;  %616 = vmatpush.msra.mxu0 %v339_v58  ;;  %v388_v7 = vld [vmem:[#allocation2 + $0x3b0] sm:$0xff]  ;;  %v341_v58 = vld [vmem:[#allocation2 + $0x238] sm:$0xff] }
 0x1ca   :  { %543 = vmatpush.msra.mxu2 %v326_v2  ;;  %563 = vmatpush.msra.mxu3 %v390_v3  ;;  %v397_v2 = vld [vmem:[#allocation2 + $0x3f8] sm:$0xff]  ;;  %v328_v3 = vld [vmem:[#allocation2 + $0x1d0] sm:$0xff] }
 0x1cb   :  { %585 = vmatpush.msra.mxu1 %v319_v11  ;;  %617 = vmatpush.msra.mxu0 %v335_v62  ;;  %v384_v11 = vld [vmem:[#allocation2 + $0x390] sm:$0xff]  ;;  %v337_v62 = vld [vmem:[#allocation2 + $0x218] sm:$0xff] }
 0x1cc   :  { %544 = vmatpush.msra.mxu2 %v322_v5  ;;  %564 = vmatpush.msra.mxu3 %v386_v6  ;;  %v393_v5 = vld [vmem:[#allocation2 + $0x3d8] sm:$0xff]  ;;  %v324_v6 = vld [vmem:[#allocation2 + $0x1b0] sm:$0xff] }
 0x1cd   :  { %586 = vmatpush.msra.mxu1 %v315_v15  ;;  %682 = vmatpush.msrb.mxu0 %v397_v2  ;;  %v317_v15 = vld [vmem:[#allocation2 + $0x178] sm:$0xff] }
 0x1ce   :  { %545 = vmatpush.msra.mxu2 %v318_v9  ;;  %565 = vmatpush.msra.mxu3 %v382_v10  ;;  %v389_v9 = vld [vmem:[#allocation2 + $0x3b8] sm:$0xff]  ;;  %v320_v10 = vld [vmem:[#allocation2 + $0x190] sm:$0xff] }
 0x1cf   :  { %587 = vmatpush.msra.mxu1 %v311_v19  ;;  %478 = vmatmul.f32.vlgmr.msrb.gmra.mxu2 %v1336_v21  ;;  %v313_v19 = vld [vmem:[#allocation2 + $0x158] sm:$0xff] }
 0x1d0   :  { %546 = vmatpush.msra.mxu2 %v314_v13  ;;  %566 = vmatpush.msra.mxu3 %v378_v14  ;;  %v316_v13 = vld [vmem:[#allocation2 + $0x170] sm:$0xff] }
 0x1d1   :  { %588 = vmatpush.msra.mxu1 %v307_v24  ;;  %498 = vmatmul.f32.vlgmr.msrb.gmra.mxu3 %v1336_v21  ;;  %v321_v21 = vld [vmem:[#allocation2 + $0x198] sm:$0xff]  ;;  %v380_v14 = vld [vmem:[#allocation2 + $0x370] sm:$0xff] }
 0x1d2   :  { %547 = vmatpush.msra.mxu2 %v310_v17  ;;  %567 = vmatpush.msra.mxu3 %v374_v18  ;;  %v312_v17 = vld [vmem:[#allocation2 + $0x150] sm:$0xff]  ;;  %v309_v24 = vld [vmem:[#allocation2 + $0x138] sm:$0xff] }
 0x1d3   :  { %589 = vmatpush.msra.mxu1 %v303_v28  ;;  %683 = vmatpush.msrb.mxu0 %v393_v5  ;;  %v376_v18 = vld [vmem:[#allocation2 + $0x350] sm:$0xff]  ;;  %v305_v28 = vld [vmem:[#allocation2 + $0x118] sm:$0xff] }
 0x1d4   :  { %548 = vmatpush.msra.mxu2 %v306_v22  ;;  %568 = vmatpush.msra.mxu3 %v370_v23  ;;  %v308_v22 = vld [vmem:[#allocation2 + $0x130] sm:$0xff] }
 0x1d5   :  { %590 = vmatpush.msra.mxu1 %v299_v32  ;;  %684 = vmatpush.msrb.mxu0 %v389_v9  ;;  %v372_v23 = vld [vmem:[#allocation2 + $0x330] sm:$0xff]  ;;  %v301_v32 = vld [vmem:[#allocation2 + $0xf8] sm:$0xff] }
 0x1d6   :  { %549 = vmatpush.msra.mxu2 %v302_v26  ;;  %569 = vmatpush.msra.mxu3 %v366_v27  ;;  %v304_v26 = vld [vmem:[#allocation2 + $0x110] sm:$0xff]  ;;  %v783_v9 = vld [vmem:[#allocation7 + $0x1f8] sm:$0xff] }
 0x1d7   :  { %591 = vmatpush.msra.mxu1 %v295_v37  ;;  %685 = vmatpush.msrb.mxu0 %v385_v12  ;;  %v368_v27 = vld [vmem:[#allocation2 + $0x310] sm:$0xff]  ;;  %v297_v37 = vld [vmem:[#allocation2 + $0xd8] sm:$0xff] }
 0x1d8   :  { %550 = vmatpush.msra.mxu2 %v298_v30  ;;  %570 = vmatpush.msra.mxu3 %v362_v31  ;;  %v300_v30 = vld [vmem:[#allocation2 + $0xf0] sm:$0xff] }
 0x1d9   :  { %592 = vmatpush.msra.mxu1 %v291_v41  ;;  %686 = vmatpush.msrb.mxu0 %v381_v16  ;;  %v364_v31 = vld [vmem:[#allocation2 + $0x2f0] sm:$0xff]  ;;  %v293_v41 = vld [vmem:[#allocation2 + $0xb8] sm:$0xff]  ;;  %v781_v16 = vld [vmem:[#allocation7 + $0x1e8] sm:$0xff] }
 0x1da   :  { %551 = vmatpush.msra.mxu2 %v294_v34  ;;  %571 = vmatpush.msra.mxu3 %v358_v36  ;;  %v296_v34 = vld [vmem:[#allocation2 + $0xd0] sm:$0xff] }
 0x1db   :  { %593 = vmatpush.msra.mxu1 %v287_v45  ;;  %687 = vmatpush.msrb.mxu0 %v377_v20  ;;  %v360_v36 = vld [vmem:[#allocation2 + $0x2d0] sm:$0xff]  ;;  %v289_v45 = vld [vmem:[#allocation2 + $0x98] sm:$0xff]  ;;  %v780_v20 = vld [vmem:[#allocation7 + $0x1e0] sm:$0xff] }
 0x1dc   :  { %552 = vmatpush.msra.mxu2 %v290_v39  ;;  %572 = vmatpush.msra.mxu3 %v354_v40  ;;  %v292_v39 = vld [vmem:[#allocation2 + $0xb0] sm:$0xff] }
 0x1dd   :  { %594 = vmatpush.msra.mxu1 %v283_v49  ;;  %688 = vmatpush.msrb.mxu0 %v373_v25  ;;  %v356_v40 = vld [vmem:[#allocation2 + $0x2b0] sm:$0xff]  ;;  %v285_v49 = vld [vmem:[#allocation2 + $0x78] sm:$0xff] }
 0x1de   :  { %553 = vmatpush.msra.mxu2 %v286_v43  ;;  %573 = vmatpush.msra.mxu3 %v350_v44  ;;  %v288_v43 = vld [vmem:[#allocation2 + $0x90] sm:$0xff]  ;;  %v779_v25 = vld [vmem:[#allocation7 + $0x1d8] sm:$0xff] }
 0x1df   :  { %595 = vmatpush.msra.mxu1 %v279_v53  ;;  %689 = vmatpush.msrb.mxu0 %v369_v29  ;;  %v352_v44 = vld [vmem:[#allocation2 + $0x290] sm:$0xff]  ;;  %v281_v53 = vld [vmem:[#allocation2 + $0x58] sm:$0xff]  ;;  %v745_v29 = vld [vmem:[#allocation7 + $0xc8] sm:$0xff] }
 0x1e0   :  { %554 = vmatpush.msra.mxu2 %v282_v47  ;;  %574 = vmatpush.msra.mxu3 %v346_v48  ;;  %v284_v47 = vld [vmem:[#allocation2 + $0x70] sm:$0xff] }
 0x1e1   :  { %596 = vmatpush.msra.mxu1 %v275_v57  ;;  %690 = vmatpush.msrb.mxu0 %v365_v33  ;;  %v348_v48 = vld [vmem:[#allocation2 + $0x270] sm:$0xff]  ;;  %v277_v57 = vld [vmem:[#allocation2 + $0x38] sm:$0xff]  ;;  %v728_v33 = vld [vmem:[#allocation7 + $0x40] sm:$0xff] }
 0x1e2   :  { %555 = vmatpush.msra.mxu2 %v278_v51  ;;  %575 = vmatpush.msra.mxu3 %v342_v52  ;;  %v280_v51 = vld [vmem:[#allocation2 + $0x50] sm:$0xff] }
 0x1e3   :  { %597 = vmatpush.msra.mxu1 %v271_v61  ;;  %691 = vmatpush.msrb.mxu0 %v361_v38  ;;  %v344_v52 = vld [vmem:[#allocation2 + $0x250] sm:$0xff]  ;;  %v273_v61 = vld [vmem:[#allocation2 + $0x18] sm:$0xff] }
 0x1e4   :  { %556 = vmatpush.msra.mxu2 %v274_v55  ;;  %576 = vmatpush.msra.mxu3 %v338_v56  ;;  %v276_v55 = vld [vmem:[#allocation2 + $0x30] sm:$0xff]  ;;  %v727_v38 = vld [vmem:[#allocation7 + $0x38] sm:$0xff] }
 0x1e5   :  { %662 = vmatpush.msrb.mxu1 %v333_v1  ;;  %692 = vmatpush.msrb.mxu0 %v357_v42  ;;  %v340_v56 = vld [vmem:[#allocation2 + $0x230] sm:$0xff] }
 0x1e6   :  { %557 = vmatpush.msra.mxu2 %v270_v59  ;;  %577 = vmatpush.msra.mxu3 %v334_v60  ;;  %v272_v59 = vld [vmem:[#allocation2 + $0x10] sm:$0xff] }
 0x1e7   :  { %663 = vmatpush.msrb.mxu1 %v329_v4  ;;  %693 = vmatpush.msrb.mxu0 %v353_v46  ;;  %v336_v60 = vld [vmem:[#allocation2 + $0x210] sm:$0xff]  ;;  %v725_v46 = vld [vmem:[#allocation7 + $0x28] sm:$0xff] }
 0x1e8   :  { %622 = vmatpush.msrb.mxu2 %v332_v63  ;;  %642 = vmatpush.msrb.mxu3 %v396_v0  ;;  %v218_v63 = vld [vmem:[%s1423_s7] sm:$0x3]  ;;  %v782_v12 = vld [vmem:[#allocation7 + $0x1f0] sm:$0xff] }
 0x1e9   :  { %664 = vmatpush.msrb.mxu1 %v325_v8  ;;  %694 = vmatpush.msrb.mxu0 %v349_v50  ;;  %v220_v0 = vperm.slane %v218_v63, 0  ;;  %v221_v1 = vperm.slane %v218_v63, 1  ;;  %v726_v42 = vld [vmem:[#allocation7 + $0x30] sm:$0xff]  ;;  %v724_v50 = vld [vmem:[#allocation7 + $0x20] sm:$0xff] }
 0x1ea   :  { %623 = vmatpush.msrb.mxu2 %v328_v3  ;;  %643 = vmatpush.msrb.mxu3 %v392_v35  ;;  %v770_v63 = vld [vmem:[#allocation7 + $0x190] sm:$0xff] }
 0x1eb   :  { %665 = vmatpush.msrb.mxu1 %v321_v21  ;;  %695 = vmatpush.msrb.mxu0 %v345_v54  ;;  %v734_v21 = vld [vmem:[#allocation7 + $0x70] sm:$0xff]  ;;  %v723_v54 = vld [vmem:[#allocation7 + $0x18] sm:$0xff] }
 0x1ec   :  { %624 = vmatpush.msrb.mxu2 %v324_v6  ;;  %644 = vmatpush.msrb.mxu3 %v388_v7  ;;  %v751_v6 = vld [vmem:[#allocation7 + $0xf8] sm:$0xff] }
 0x1ed   :  { %666 = vmatpush.msrb.mxu1 %v317_v15  ;;  %696 = vmatpush.msrb.mxu0 %v341_v58  ;;  %v735_v7 = vld [vmem:[#allocation7 + $0x78] sm:$0xff]  ;;  %v733_v15 = vld [vmem:[#allocation7 + $0x68] sm:$0xff]  ;;  %v722_v58 = vld [vmem:[#allocation7 + $0x10] sm:$0xff] }
 0x1ee   :  { %625 = vmatpush.msrb.mxu2 %v320_v10  ;;  %645 = vmatpush.msrb.mxu3 %v384_v11  ;;  %v767_v10 = vld [vmem:[#allocation7 + $0x178] sm:$0xff]  ;;  %v750_v11 = vld [vmem:[#allocation7 + $0xf0] sm:$0xff] }
 0x1ef   :  { %667 = vmatpush.msrb.mxu1 %v313_v19  ;;  %697 = vmatpush.msrb.mxu0 %v337_v62  ;;  %v732_v19 = vld [vmem:[#allocation7 + $0x60] sm:$0xff]  ;;  %v757_v62 = vld [vmem:[#allocation7 + $0x128] sm:$0xff] }
 0x1f0   :  { %626 = vmatpush.msrb.mxu2 %v316_v13  ;;  %646 = vmatpush.msrb.mxu3 %v380_v14  ;;  %v766_v13 = vld [vmem:[#allocation7 + $0x170] sm:$0xff]  ;;  %v749_v14 = vld [vmem:[#allocation7 + $0xe8] sm:$0xff] }
 0x1f1   :  { %668 = vmatpush.msrb.mxu1 %v309_v24  ;;  %v731_v24 = vld [vmem:[#allocation7 + $0x58] sm:$0xff] }
 0x1f2   :  { %627 = vmatpush.msrb.mxu2 %v312_v17  ;;  %647 = vmatpush.msrb.mxu3 %v376_v18  ;;  %v765_v17 = vld [vmem:[#allocation7 + $0x168] sm:$0xff]  ;;  %v748_v18 = vld [vmem:[#allocation7 + $0xe0] sm:$0xff] }
 0x1f3   :  { %669 = vmatpush.msrb.mxu1 %v305_v28  ;;  %v778_v28 = vld [vmem:[#allocation7 + $0x1d0] sm:$0xff] }
 0x1f4   :  { %628 = vmatpush.msrb.mxu2 %v308_v22  ;;  %648 = vmatpush.msrb.mxu3 %v372_v23  ;;  %v764_v22 = vld [vmem:[#allocation7 + $0x160] sm:$0xff]  ;;  %v747_v23 = vld [vmem:[#allocation7 + $0xd8] sm:$0xff] }
 0x1f5   :  { %670 = vmatpush.msrb.mxu1 %v301_v32  ;;  %v744_v32 = vld [vmem:[#allocation7 + $0xc0] sm:$0xff] }
 0x1f6   :  { %629 = vmatpush.msrb.mxu2 %v304_v26  ;;  %649 = vmatpush.msrb.mxu3 %v368_v27  ;;  %v746_v26 = vld [vmem:[#allocation7 + $0xd0] sm:$0xff] }
 0x1f7   :  { %671 = vmatpush.msrb.mxu1 %v297_v37  ;;  %v730_v27 = vld [vmem:[#allocation7 + $0x50] sm:$0xff]  ;;  %v741_v37 = vld [vmem:[#allocation7 + $0xa8] sm:$0xff] }
 0x1f8   :  { %630 = vmatpush.msrb.mxu2 %v300_v30  ;;  %650 = vmatpush.msrb.mxu3 %v364_v31  ;;  %v729_v30 = vld [vmem:[#allocation7 + $0x48] sm:$0xff] }
 0x1f9   :  { %672 = vmatpush.msrb.mxu1 %v293_v41  ;;  %v777_v31 = vld [vmem:[#allocation7 + $0x1c8] sm:$0xff]  ;;  %v776_v41 = vld [vmem:[#allocation7 + $0x1c0] sm:$0xff] }
 0x1fa   :  { %631 = vmatpush.msrb.mxu2 %v296_v34  ;;  %651 = vmatpush.msrb.mxu3 %v360_v36  ;;  %v743_v34 = vld [vmem:[#allocation7 + $0xb8] sm:$0xff]  ;;  %v742_v36 = vld [vmem:[#allocation7 + $0xb0] sm:$0xff] }
 0x1fb   :  { %673 = vmatpush.msrb.mxu1 %v289_v45  ;;  %v775_v45 = vld [vmem:[#allocation7 + $0x1b8] sm:$0xff] }
 0x1fc   :  { %632 = vmatpush.msrb.mxu2 %v292_v39  ;;  %652 = vmatpush.msrb.mxu3 %v356_v40  ;;  %v740_v39 = vld [vmem:[#allocation7 + $0xa0] sm:$0xff]  ;;  %v763_v40 = vld [vmem:[#allocation7 + $0x158] sm:$0xff] }
 0x1fd   :  { %674 = vmatpush.msrb.mxu1 %v285_v49  ;;  %v774_v49 = vld [vmem:[#allocation7 + $0x1b0] sm:$0xff] }
 0x1fe   :  { %633 = vmatpush.msrb.mxu2 %v288_v43  ;;  %653 = vmatpush.msrb.mxu3 %v352_v44  ;;  %v739_v43 = vld [vmem:[#allocation7 + $0x98] sm:$0xff]  ;;  %v762_v44 = vld [vmem:[#allocation7 + $0x150] sm:$0xff] }
 0x1ff   :  { %675 = vmatpush.msrb.mxu1 %v281_v53  ;;  %v773_v53 = vld [vmem:[#allocation7 + $0x1a8] sm:$0xff] }
 0x200   :  { %634 = vmatpush.msrb.mxu2 %v284_v47  ;;  %654 = vmatpush.msrb.mxu3 %v348_v48  ;;  %v738_v47 = vld [vmem:[#allocation7 + $0x90] sm:$0xff]  ;;  %v761_v48 = vld [vmem:[#allocation7 + $0x148] sm:$0xff] }
 0x201   :  { %676 = vmatpush.msrb.mxu1 %v277_v57  ;;  %v772_v57 = vld [vmem:[#allocation7 + $0x1a0] sm:$0xff] }
 0x202   :  { %635 = vmatpush.msrb.mxu2 %v280_v51  ;;  %655 = vmatpush.msrb.mxu3 %v344_v52  ;;  %v737_v51 = vld [vmem:[#allocation7 + $0x88] sm:$0xff]  ;;  %v760_v52 = vld [vmem:[#allocation7 + $0x140] sm:$0xff] }
 0x203   :  { %677 = vmatpush.msrb.mxu1 %v273_v61  ;;  %v721_v61 = vld [vmem:[#allocation7 + $0x8] sm:$0xff] }
 0x204   :  { %636 = vmatpush.msrb.mxu2 %v276_v55  ;;  %656 = vmatpush.msrb.mxu3 %v340_v56  ;;  %v736_v55 = vld [vmem:[#allocation7 + $0x80] sm:$0xff]  ;;  %v759_v56 = vld [vmem:[#allocation7 + $0x138] sm:$0xff] }
 0x206   :  { %637 = vmatpush.msrb.mxu2 %v272_v59  ;;  %657 = vmatpush.msrb.mxu3 %v336_v60  ;;  %v758_v59 = vld [vmem:[#allocation7 + $0x130] sm:$0xff]  ;;  %v771_v60 = vld [vmem:[#allocation7 + $0x198] sm:$0xff] }
 0x24a   :  { %v245_v2 = vpop.f32.mrf.mxu2  ;;  %v265_v3 = vpop.f32.mrf.mxu3 }
 0x24b   :  { %v246_v35 = vadd.f32 %v245_v2, %v220_v0  ;;  %v266_v4 = vadd.f32 %v265_v3, %v221_v1  ;;  %v720_v0 = vld [vmem:[#allocation7] sm:$0xff]  ;;  %v769_v2 = vld [vmem:[#allocation7 + $0x188] sm:$0xff]  ;;  %v755_v3 = vld [vmem:[#allocation7 + $0x118] sm:$0xff] }
 0x24c   :  { %v756_v1 = vld [vmem:[#allocation7 + $0x120] sm:$0xff] }
 0x24d   :  { %976 = vtanh.f32 %v246_v35  ;;  %v768_v35 = vld [vmem:[#allocation7 + $0x180] sm:$0xff] }
 0x24e   :  { %978 = vtanh.f32 %v266_v4  ;;  %v754_v4 = vld [vmem:[#allocation7 + $0x110] sm:$0xff] }
 0x253   :  { %v977_v5 = vpop.eup %976 }
 0x254   :  { %v979_v8 = vpop.eup %978  ;;  %558 = vmatmul.f32.vlgmr.msra.gmra.mxu2 %v977_v5  ;;  %598 = vmatmul.f32.vlgmr.msra.gmra.mxu1 %v977_v5 }
 0x255   :  { %578 = vmatmul.f32.vlgmr.msra.gmra.mxu3 %v979_v8  ;;  %618 = vmatmul.f32.vlgmr.msra.gmra.mxu0 %v979_v8 }
 0x256   :  { %808 = vmatpush.msra.mxu3 %v751_v6  ;;  %788 = vmatpush.msra.mxu2 %v735_v7  ;;  %v752_v6 = vld [vmem:[#allocation7 + $0x100] sm:$0xff]  ;;  %v519_v7 = vpop.f32.mrf.mxu1 }
 0x257   :  { %848 = vmatpush.msra.mxu0 %v783_v9  ;;  %828 = vmatpush.msra.mxu1 %v767_v10  ;;  %v479_v9 = vpop.f32.mrf.mxu2  ;;  %v702_v10 = vld [vmem:[%s1426_s10] sm:$0xf] }
 0x258   :  { %809 = vmatpush.msra.mxu3 %v750_v11  ;;  %789 = vmatpush.msra.mxu2 %v734_v21  ;;  %v499_v11 = vpop.f32.mrf.mxu3 }
 0x259   :  { %849 = vmatpush.msra.mxu0 %v782_v12  ;;  %829 = vmatpush.msra.mxu1 %v766_v13 }
 0x25a   :  { %810 = vmatpush.msra.mxu3 %v749_v14  ;;  %790 = vmatpush.msra.mxu2 %v733_v15  ;;  %v705_v14 = vperm.slane %v702_v10, 1 }
 0x25b   :  { %850 = vmatpush.msra.mxu0 %v781_v16  ;;  %830 = vmatpush.msra.mxu1 %v765_v17 }
 0x25c   :  { %638 = vmatmul.f32.vlgmr.msrb.gmra.mxu2 %v977_v5  ;;  %678 = vmatmul.f32.vlgmr.msrb.gmra.mxu1 %v977_v5  ;;  %v753_v5 = vld [vmem:[#allocation7 + $0x108] sm:$0xff] }
 0x25d   :  { %658 = vmatmul.f32.vlgmr.msrb.gmra.mxu3 %v979_v8  ;;  %698 = vmatmul.f32.vlgmr.msrb.gmra.mxu0 %v979_v8  ;;  %v539_v8 = vpop.f32.mrf.mxu0 }
 0x25e   :  { %811 = vmatpush.msra.mxu3 %v748_v18  ;;  %791 = vmatpush.msra.mxu2 %v732_v19 }
 0x25f   :  { %851 = vmatpush.msra.mxu0 %v780_v20  ;;  %831 = vmatpush.msra.mxu1 %v764_v22  ;;  %v704_v22 = vperm.slane %v702_v10, 0 }
 0x260   :  { %812 = vmatpush.msra.mxu3 %v747_v23  ;;  %792 = vmatpush.msra.mxu2 %v731_v24 }
 0x261   :  { %852 = vmatpush.msra.mxu0 %v779_v25  ;;  %832 = vmatpush.msra.mxu1 %v763_v40 }
 0x262   :  { %813 = vmatpush.msra.mxu3 %v746_v26  ;;  %793 = vmatpush.msra.mxu2 %v730_v27  ;;  %v707_v26 = vperm.slane %v702_v10, 3 }
 0x263   :  { %853 = vmatpush.msra.mxu0 %v778_v28  ;;  %833 = vmatpush.msra.mxu1 %v762_v44 }
 0x264   :  { %814 = vmatpush.msra.mxu3 %v745_v29  ;;  %794 = vmatpush.msra.mxu2 %v729_v30 }
 0x265   :  { %854 = vmatpush.msra.mxu0 %v777_v31  ;;  %834 = vmatpush.msra.mxu1 %v761_v48 }
 0x266   :  { %815 = vmatpush.msra.mxu3 %v744_v32  ;;  %795 = vmatpush.msra.mxu2 %v728_v33 }
 0x267   :  { %855 = vmatpush.msra.mxu0 %v776_v41  ;;  %835 = vmatpush.msra.mxu1 %v760_v52  ;;  %v971_v41 = vld [vmem:[%s1428_s12] ss:$0 sm:$0xff]  ;;  %s1173_s12 = smov [#allocation12]  }
 0x268   :  { %816 = vmatpush.msra.mxu3 %v743_v34  ;;  %796 = vmatpush.msra.mxu2 %v727_v38  ;;  %s926_s13 = sshll.u32 %s1173_s12, 4  ;;  %s927_s13 = int_to_ptr.vmem [resolvable:$true] %s926_s13 }
 0x269   :  { %856 = vmatpush.msra.mxu0 %v775_v45  ;;  %836 = vmatpush.msra.mxu1 %v759_v56 }
 0x26a   :  { %817 = vmatpush.msra.mxu3 %v742_v36  ;;  %797 = vmatpush.msra.mxu2 %v726_v42  ;;  %v706_v36 = vperm.slane %v702_v10, 2 }
 0x26b   :  { %857 = vmatpush.msra.mxu0 %v774_v49  ;;  %837 = vmatpush.msra.mxu1 %v758_v59 }
 0x26c   :  { %818 = vmatpush.msra.mxu3 %v741_v37  ;;  %798 = vmatpush.msra.mxu2 %v725_v46 }
 0x26d   :  { %858 = vmatpush.msra.mxu0 %v773_v53  ;;  %838 = vmatpush.msra.mxu1 %v757_v62 }
 0x26e   :  { %819 = vmatpush.msra.mxu3 %v740_v39  ;;  %799 = vmatpush.msra.mxu2 %v724_v50 }
 0x26f   :  { %859 = vmatpush.msra.mxu0 %v772_v57  ;;  %839 = vmatpush.msra.mxu1 %v756_v1 }
 0x270   :  { %820 = vmatpush.msra.mxu3 %v739_v43  ;;  %800 = vmatpush.msra.mxu2 %v723_v54 }
 0x271   :  { %860 = vmatpush.msra.mxu0 %v771_v60  ;;  %840 = vmatpush.msra.mxu1 %v755_v3 }
 0x272   :  { %821 = vmatpush.msra.mxu3 %v738_v47  ;;  %801 = vmatpush.msra.mxu2 %v722_v58 }
 0x273   :  { %861 = vmatpush.msra.mxu0 %v770_v63  ;;  %841 = vmatpush.msra.mxu1 %v754_v4 }
 0x274   :  { %822 = vmatpush.msra.mxu3 %v737_v51  ;;  %802 = vmatpush.msra.mxu2 %v721_v61 }
 0x275   :  { %862 = vmatpush.msra.mxu0 %v769_v2  ;;  %842 = vmatpush.msra.mxu1 %v753_v5 }
 0x276   :  { %823 = vmatpush.msra.mxu3 %v736_v55  ;;  %803 = vmatpush.msra.mxu2 %v720_v0 }
 0x277   :  { %863 = vmatpush.msra.mxu0 %v768_v35  ;;  %843 = vmatpush.msra.mxu1 %v752_v6 }
 0x2d1   :  { %v599_v21 = vpop.f32.mrf.mxu1 }
 0x2d2   :  { %v600_v12 = vadd.f32 %v599_v21, %v499_v11  ;;  %v619_v13 = vpop.f32.mrf.mxu0 }
 0x2d4   :  { %v620_v15 = vadd.f32 %v619_v13, %v600_v12 }
 0x2d6   :  { %v713_v16 = vadd.f32 %v705_v14, %v620_v15 }
 0x2d7   :  { %v559_v17 = vpop.f32.mrf.mxu2 }
 0x2d8   :  { %v717_v18 = vmax.f32 %v713_v16, 0.0  ;;  %v560_v19 = vadd.f32 %v559_v17, %v479_v9  ;;  %v579_v20 = vpop.f32.mrf.mxu3 }
 0x2d9   :  { %v679_v23 = vpop.f32.mrf.mxu1 }
 0x2da   :  { %v580_v24 = vadd.f32 %v579_v20, %v560_v19  ;;  %v680_v25 = vadd.f32 %v679_v23, %v539_v8  ;;  %824 = vmatmul.f32.vlgmr.msra.gmra.mxu3 %v717_v18  ;;  %v699_v27 = vpop.f32.mrf.mxu0 }
 0x2dc   :  { %v712_v28 = vadd.f32 %v704_v22, %v580_v24  ;;  %v700_v29 = vadd.f32 %v699_v27, %v680_v25 }
 0x2de   :  { %v716_v30 = vmax.f32 %v712_v28, 0.0  ;;  %v715_v31 = vadd.f32 %v707_v26, %v700_v29 }
 0x2df   :  { %v639_v32 = vpop.f32.mrf.mxu2 }
 0x2e0   :  { %v719_v33 = vmax.f32 %v715_v31, 0.0  ;;  %v640_v34 = vadd.f32 %v639_v32, %v519_v7  ;;  %804 = vmatmul.f32.vlgmr.msra.gmra.mxu2 %v716_v30  ;;  %v659_v37 = vpop.f32.mrf.mxu3 }
 0x2e2   :  { %v660_v38 = vadd.f32 %v659_v37, %v640_v34  ;;  %864 = vmatmul.f32.vlgmr.msra.gmra.mxu0 %v719_v33 }
 0x2e4   :  { %v714_v39 = vadd.f32 %v706_v36, %v660_v38 }
 0x2e6   :  { %v718_v40 = vmax.f32 %v714_v39, 0.0 }
 0x2e8   :  { %844 = vmatmul.f32.vlgmr.msra.gmra.mxu1 %v718_v40 }
 0x35d   :  { %v825_v44 = vpop.f32.mrf.mxu3 }
 0x35f   :  { %v865_v48 = vpop.f32.mrf.mxu0 }
 0x363   :  { %v805_v42 = vpop.f32.mrf.mxu2 }
 0x364   :  { %v806_v43 = vadd.f32 %v971_v41, %v805_v42 }
 0x365   :  { %v845_v46 = vpop.f32.mrf.mxu1 }
 0x366   :  { %v826_v45 = vadd.f32 %v825_v44, %v806_v43 }
 0x368   :  { %v846_v47 = vadd.f32 %v845_v46, %v826_v45 }
 0x36a   :  { %v866_v49 = vadd.f32 %v865_v48, %v846_v47 }
 0x36c   :  { %v956_v50 = vmul.f32 -1.442695, %v866_v49 }
 0x36e   :  { %980 = vpow2.f32 %v956_v50 }
 0x374   :  { %v981_v51 = vpop.eup %980 }
 0x375   :  { %v871_v52 = vadd.f32 1.0, %v981_v51 }
 0x377   :  { %982 = vrcp.f32 %v871_v52  ;;  %v883_v56 = vand.u32 2147483648, %v871_v52  ;;  %v881_v58 = vand.u32 2147483647, %v871_v52  ;;  %vm877_vm5 = vweird.f32 %v871_v52 }
 0x379   :  { %v884_v60 = vor.u32 1.1754944e-38, %v883_v56  ;;  %vm882_vm7 = vcmp.eq.f32.partialorder %v881_v58, 8.507059e+37 }
 0x37d   :  { %v983_v53 = vpop.eup %982 }
 0x37e   :  { %v873_v54 = vmul.f32 %v983_v53, %v871_v52  ;;  %vm878_vm4 = vweird.f32 %v983_v53 }
 0x37f   :  { %vm879_vm6 = vmor %vm877_vm5, %vm878_vm4 }
 0x380   :  { %v874_v55 = vsub.f32 1.0, %v873_v54 }
 0x382   :  { %v875_v57 = vmul.f32 %v983_v53, %v874_v55 }
 0x384   :  { %v876_v59 = vadd.f32 %v983_v53, %v875_v57 }
 0x386   :  { %v880_v61 = vsel %vm879_vm6, %v983_v53, %v876_v59 }
 0x387   :  { %v885_v62 = vsel %vm882_vm7, %v884_v60, %v880_v61 }
 0x388   :  { %887 = vst [vmem:[#allocation12] sm:$0x3] %v885_v62 }
 0x389   :  { %931 = dma.vmem_to_hbm [thread:$0]  %s927_s13, 32, %s929_s20, [#allocation13]  }
 0x38a   :  { %1156 = dma.done.wait [#allocation4], 32  }
 0x38b   :  { %1157 = vsyncadd [#allocation4], 4294967264 }
 0x38c   :  { %1158 = dma.done.wait [#allocation10], 64  }
 0x38d   :  { %1159 = vsyncadd [#allocation10], 4294967232 }
 0x38e   :  { %1160 = dma.done.wait [#allocation13], 32  }
 0x38f   :  { %1161 = vsyncadd [#allocation13], 4294967264 }
 0x390   :  { %948 = vsyncpa [#allocation3], 1 }
 0x391   :  { %949 = vsyncpa [#allocation6], 1 }
 0x392   :  { %950 = vsyncpa [#allocation4], 1 }
 0x393   :  { %951 = vsyncpa [#allocation10], 1 }
 0x394   :  { %952 = vsyncpa [#allocation13], 1 }

</bundles_post_ra>
